<compile_context>
chip_gen: v7x
topology: tpu7x:2x2x1
jax: 0.10.0
libtpu: 0.0.40
codegen_flags: <defaults>
</compile_context>

<pallas_src>
import functools

import jax
import jax.numpy as jnp
from jax.experimental import pallas as pl
from jax.experimental.pallas import tpu as pltpu


# ----------------------------------------------------------------------------
# helpers
# ----------------------------------------------------------------------------
def _round_up(x, m):
    return ((x + m - 1) // m) * m


@functools.lru_cache(maxsize=1)
def _vmem_capacity_bytes():
    """Physical VMEM per TensorCore; conservative 64 MiB (v7x) fallback."""
    try:
        cap = int(pltpu.get_tpu_info().vmem_capacity_bytes)
        if cap > 0:
            return cap
    except Exception:
        pass
    return 64 << 20


def _largest_tile(total_pad, cap_elems):
    """Largest multiple of 128 that divides total_pad (a 128-multiple) and <= cap_elems."""
    units = total_pad // 128
    cap_units = max(1, cap_elems // 128)
    best = 1
    for d in range(1, units + 1):
        if units % d == 0 and d <= cap_units:
            best = d
    return best * 128


def _plan_tiles(batch, in_pad, out_pad, ncls_pad, max_k_tile, max_n_tile):
    """Pick (tm, tk, tn) so double-buffered bf16 tiles fit a per-generation VMEM budget."""
    # tm multiple of 16 (bf16 sublane packing); cap at 128 so B>=256 yields >=2 M tiles
    # (keeps both v7x TensorCores busy) while matching the v5e 128-wide MXU.
    tm = _round_up(min(max(batch, 1), 128), 16)

    cap = _vmem_capacity_bytes()
    budget = int(cap * 0.6)                         # headroom for Mosaic internal scratch

    f32, bf16 = 4, 2
    fixed = 2 * out_pad * f32 + 2 * tm * out_pad * f32       # fc bias + feats/acc block
    per_tn = 2 * (out_pad * bf16 + f32 + tm * f32)           # head W/b + logits out (x2 buf)
    per_tk = 2 * (tm + out_pad) * bf16                       # x + fc W tiles        (x2 buf)

    avail = max(budget - fixed, 128 * (per_tn + per_tk))
    tn = _largest_tile(ncls_pad, min(max(128, (avail // 3) // per_tn), max_n_tile))
    tk = _largest_tile(in_pad, min(max(128, (avail - per_tn * tn) // per_tk), max_k_tile))
    return tm, tk, tn


# ----------------------------------------------------------------------------
# Fused Pallas kernel: backbone fc (K-tiled, accumulated) + fused heads (N-tiled)
# ----------------------------------------------------------------------------
def _make_kernel(nk, with_features):
    def kernel(x_ref, fc_w_ref, fc_b_ref, hw_ref, hb_ref, *rest):
        if with_features:
            feats_ref, logits_ref = rest
            acc_ref = feats_ref          # accumulate directly into resident feats block
        else:
            logits_ref, acc_ref = rest   # acc_ref is VMEM scratch (no feats writeback)

        k = pl.program_id(1)

        @pl.when(k == 0)
        def _():
            acc_ref[...] = jnp.zeros_like(acc_ref)

        # phase 1: K-tiled backbone fc accumulation (bf16 MXU, f32 accumulate)
        @pl.when(k < nk)
        def _():
            acc_ref[...] += jnp.dot(x_ref[...], fc_w_ref[...],
                                    preferred_element_type=jnp.float32)

        @pl.when(k == nk - 1)
        def _():
            acc_ref[...] += fc_b_ref[...]

        # phase 2 (overlaps the last K step): N-tiled fused-heads matmul on resident feats
        @pl.when(k >= nk - 1)
        def _():
            feats_bf16 = acc_ref[...].astype(jnp.bfloat16)
            logits = jnp.dot(feats_bf16, hw_ref[...],
                             preferred_element_type=jnp.float32) + hb_ref[...]
            logits_ref[...] = logits.astype(logits_ref.dtype)

    return kernel


@functools.partial(jax.jit, static_argnames=("tm", "tk", "tn", "with_features"))
def _fused_forward(x_flat, fc_w_p, fc_b_p, hw_p, hb_p, *, tm, tk, tn, with_features):
    batch, in_dim = x_flat.shape
    in_pad, out_pad = fc_w_p.shape
    ncls_pad = hw_p.shape[1]
    b_pad = _round_up(batch, tm)

    # zero padding is mathematically inert; bf16 cast feeds the fast MXU path
    xp = jnp.pad(x_flat.astype(jnp.bfloat16), ((0, b_pad - batch), (0, in_pad - in_dim)))

    nk = in_pad // tk
    nj = ncls_pad // tn
    last_k = nk - 1
    grid = (b_pad // tm, nk + nj - 1)      # phased axis: nk fc steps + (nj-1) extra head steps

    f32, bf16 = 4, 2
    est = (2 * tm * tk * bf16              # x tiles
           + 2 * tk * out_pad * bf16       # fc W tiles
           + 2 * out_pad * f32             # fc bias
           + 2 * out_pad * tn * bf16       # head W tiles
           + 2 * tn * f32                  # head bias
           + 2 * tm * tn * f32             # logits out
           + 2 * tm * out_pad * f32)       # feats out / acc scratch
    cap = _vmem_capacity_bytes()
    vmem_limit = int(min(max(2 * est, 32 << 20), cap - (8 << 20)))

    in_specs = [
        # x / fc_w block indices are frozen at the last K block during the head phase,
        # so no input tile is ever DMA'd twice within one M tile.
        pl.BlockSpec((tm, tk), lambda i, k: (i, jnp.minimum(k, last_k))),
        pl.BlockSpec((tk, out_pad), lambda i, k: (jnp.minimum(k, last_k), 0)),
        pl.BlockSpec((1, out_pad), lambda i, k: (0, 0)),
        pl.BlockSpec((out_pad, tn), lambda i, k: (0, jnp.maximum(k - last_k, 0))),
        pl.BlockSpec((1, tn), lambda i, k: (0, jnp.maximum(k - last_k, 0))),
    ]
    logits_spec = pl.BlockSpec((tm, tn), lambda i, k: (i, jnp.maximum(k - last_k, 0)))
    logits_shape = jax.ShapeDtypeStruct((b_pad, ncls_pad), jnp.float32)

    if with_features:
        out_shape = (jax.ShapeDtypeStruct((b_pad, out_pad), jnp.float32), logits_shape)
        out_specs = [pl.BlockSpec((tm, out_pad), lambda i, k: (i, 0)), logits_spec]
        scratch = []
    else:
        out_shape = logits_shape
        out_specs = logits_spec
        scratch = [pltpu.VMEM((tm, out_pad), jnp.float32)]

    return pl.pallas_call(
        _make_kernel(nk, with_features),
        out_shape=out_shape,
        grid_spec=pltpu.PrefetchScalarGridSpec(
            num_scalar_prefetch=0,
            grid=grid,
            in_specs=in_specs,
            out_specs=out_specs,
            scratch_shapes=scratch,
        ),
        compiler_params=pltpu.CompilerParams(
            dimension_semantics=("parallel", "arbitrary"),
            vmem_limit_bytes=vmem_limit,
        ),
    )(xp, fc_w_p, fc_b_p, hw_p, hb_p)


# ----------------------------------------------------------------------------
# LLL_Net equivalent (JAX glue around the fused Pallas kernel)
# ----------------------------------------------------------------------------
class LLLNetPallas:
    """Mirrors LLL_Net: backbone -> list of task-head outputs (multi-head)."""

    def __init__(self, in_features, out_size, key, *, max_k_tile=4096, max_n_tile=2048):
        # Synthetic backbone: flatten + Linear(in_features, out_size) as head_var 'fc'.
        # remove_existing_head=False  =>  self.out_size = fc.out_features
        # TODO(synk): a real conv backbone (e.g. ResNet) would need its own kernels.
        self.in_features = in_features
        self.out_size = out_size
        self.max_k_tile = max_k_tile
        self.max_n_tile = max_n_tile
        self._in_pad = _round_up(in_features, 128)
        self._out_pad = _round_up(out_size, 128)

        k_w, k_b = jax.random.split(key)
        bound = 1.0 / float(jnp.sqrt(in_features))
        # weight stored as (in, out)  (transpose of PyTorch's (out, in))
        self.fc_w = jax.random.uniform(k_w, (in_features, out_size),
                                       minval=-bound, maxval=bound, dtype=jnp.float32)
        self.fc_b = jax.random.uniform(k_b, (out_size,),
                                       minval=-bound, maxval=bound, dtype=jnp.float32)
        # cached padded/bf16 weights (never re-padded inside forward)
        self._fc_w_p = jnp.pad(self.fc_w,
                               ((0, self._in_pad - in_features),
                                (0, self._out_pad - out_size))).astype(jnp.bfloat16)
        self._fc_b_p = jnp.pad(self.fc_b, (0, self._out_pad - out_size)).reshape(1, self._out_pad)

        self.heads = []            # list of (W:(out_size, n_out), b:(n_out,)) in f32
        self.task_cls = []
        self.task_offset = []
        self._total_cls = 0
        self._hw_p = None          # cached fused head weight (out_pad, ncls_pad) bf16
        self._hb_p = None          # cached fused head bias   (1, ncls_pad) f32

    def add_head(self, num_outputs, key):
        k_w, k_b = jax.random.split(key)
        bound = 1.0 / float(jnp.sqrt(self.out_size))
        w = jax.random.uniform(k_w, (self.out_size, num_outputs),
                               minval=-bound, maxval=bound, dtype=jnp.float32)
        b = jax.random.uniform(k_b, (num_outputs,),
                               minval=-bound, maxval=bound, dtype=jnp.float32)
        self.heads.append((w, b))
        self.task_cls = [hw.shape[1] for hw, _ in self.heads]
        offs = [0]
        for c in self.task_cls[:-1]:
            offs.append(offs[-1] + c)
        self.task_offset = offs
        self._rebuild_head_cache()

    def _rebuild_head_cache(self):
        hw = jnp.concatenate([w for w, _ in self.heads], axis=1)
        hb = jnp.concatenate([b for _, b in self.heads], axis=0)
        self._total_cls = hw.shape[1]
        ncls_pad = _round_up(self._total_cls, 128)
        self._hw_p = jnp.pad(hw, ((0, self._out_pad - self.out_size),
                                  (0, ncls_pad - self._total_cls))).astype(jnp.bfloat16)
        self._hb_p = jnp.pad(hb, (0, ncls_pad - self._total_cls)).reshape(1, ncls_pad)

    def forward(self, x, return_features=False):
        assert len(self.heads) > 0, "Cannot access any head"
        batch = x.shape[0]
        # x: NCHW (B, C, H, W) -> flatten row-major (matches torch.flatten)
        x_flat = x.reshape(batch, -1).astype(jnp.float32)
        tm, tk, tn = _plan_tiles(batch, self._in_pad, self._out_pad, self._hw_p.shape[1],
                                 self.max_k_tile, self.max_n_tile)
        out = _fused_forward(x_flat, self._fc_w_p, self._fc_b_p, self._hw_p, self._hb_p,
                             tm=tm, tk=tk, tn=tn, with_features=bool(return_features))
        if return_features:
            feats_p, logits_p = out
            feats = feats_p[:batch, :self.out_size]
        else:
            logits_p = out
            feats = None
        logits = logits_p[:batch, :self._total_cls]
        y = [logits[:, off:off + c] for off, c in zip(self.task_offset, self.task_cls)]
        return (y, feats) if return_features else y

    __call__ = forward


# ----------------------------------------------------------------------------
# Pure-JAX references for correctness checks
# ----------------------------------------------------------------------------
def _ref_forward_f32(net, x):
    b = x.shape[0]
    xf = x.reshape(b, -1).astype(jnp.float32)
    feats = xf @ net.fc_w + net.fc_b
    return [feats @ w + bb for w, bb in net.heads], feats


def _ref_forward_bf16(net, x):
    """Mirrors the kernel numerics: bf16 MXU inputs, f32 accumulation, f32 bias."""
    b = x.shape[0]
    xb = x.reshape(b, -1).astype(jnp.bfloat16)
    feats = jnp.dot(xb, net.fc_w.astype(jnp.bfloat16),
                    preferred_element_type=jnp.float32) + net.fc_b
    fb = feats.astype(jnp.bfloat16)
    ys = [jnp.dot(fb, w.astype(jnp.bfloat16),
                  preferred_element_type=jnp.float32) + bb for w, bb in net.heads]
    return ys, feats


if __name__ == "__main__":
    key = jax.random.PRNGKey(0)
    k_x, k_backbone, k_h0, k_h1, k_h2 = jax.random.split(key, 5)

    # small shapes: batch=2, channels=4, spatial=16x16 -> in_features = 1024
    B, C, H, W = 2, 4, 16, 16
    OUT_SIZE = 32
    x = jax.random.normal(k_x, (B, C, H, W), dtype=jnp.float32)

    # max_k_tile=256 -> 4 K-accumulation steps; max_n_tile=128 with 132 total classes
    # -> 2 head tiles, so both phases of the fused kernel are exercised.
    net = LLLNetPallas(in_features=C * H * W, out_size=OUT_SIZE, key=k_backbone,
                       max_k_tile=256, max_n_tile=128)
    net.add_head(4, k_h0)      # task 0: 4 classes
    net.add_head(4, k_h1)      # task 1: 4 classes
    net.add_head(124, k_h2)    # task 2: 124 classes (pushes total past one 128-lane tile)

    y_list, feats = net.forward(x, return_features=True)
    y_list = [jax.block_until_ready(y) for y in y_list]
    feats = jax.block_until_ready(feats)
    y_only = [jax.block_until_ready(y) for y in net.forward(x)]   # no-features path

    assert len(y_list) == 3 and len(y_only) == 3
    assert feats.shape == (B, OUT_SIZE)
    for y, n in zip(y_list, (4, 4, 124)):
        assert y.shape == (B, n)

    # tight check vs a reference with the same numerics (bf16 MXU inputs, f32 accumulation)
    y_bref, f_bref = _ref_forward_bf16(net, x)
    assert jnp.allclose(feats, f_bref, atol=5e-3, rtol=5e-3)
    for y, yo, yr in zip(y_list, y_only, y_bref):
        assert jnp.allclose(y, yr, atol=5e-3, rtol=5e-3)
        assert jnp.allclose(yo, yr, atol=5e-3, rtol=5e-3)

    # loose sanity check vs the full-f32 PyTorch-equivalent reference
    y_fref, f_fref = _ref_forward_f32(net, x)
    assert jnp.allclose(feats, f_fref, atol=1e-1, rtol=1e-1)
    for y, yr in zip(y_list, y_fref):
        assert jnp.allclose(y, yr, atol=1e-1, rtol=1e-1)

    print("KERNEL_OK")
</pallas_src>

<mosaic_0001>
module attributes {stable_mosaic.version = 11 : i64} {
  func.func @kernel(%arg0: i32, %arg1: i32, %arg2: memref<16x256xbf16, #tpu.memory_space<vmem>>, %arg3: memref<256x128xbf16, #tpu.memory_space<vmem>>, %arg4: memref<1x128xf32, #tpu.memory_space<vmem>>, %arg5: memref<128x128xbf16, #tpu.memory_space<vmem>>, %arg6: memref<1x128xf32, #tpu.memory_space<vmem>>, %arg7: memref<16x128xf32, #tpu.memory_space<vmem>>, %arg8: memref<16x128xf32, #tpu.memory_space<vmem>>) attributes {dimension_semantics = [#tpu.dimension_semantics<parallel>, #tpu.dimension_semantics<arbitrary>], iteration_bounds = array<i64: 1, 5>, scalar_prefetch = 0 : i64, scratch_operands = 0 : i64, tpu.core_type = #tpu.core_type<tc>, window_params = [{transform_indices = @transform_0, window_bounds = array<i64: 16, 256>}, {transform_indices = @transform_1, window_bounds = array<i64: 256, 128>}, {pipeline_mode = #tpu.pipeline_mode<synchronous>, transform_indices = @transform_2, window_bounds = array<i64: 1, 128>}, {transform_indices = @transform_3, window_bounds = array<i64: 128, 128>}, {transform_indices = @transform_4, window_bounds = array<i64: 1, 128>}, {transform_indices = @transform_5, window_bounds = array<i64: 16, 128>}, {transform_indices = @transform_6, window_bounds = array<i64: 16, 128>}]} {
    %c0_i32 = arith.constant 0 : i32
    %0 = arith.cmpi eq, %arg1, %c0_i32 : i32
    %1 = arith.extui %0 : i1 to i32
    %c0_i32_0 = arith.constant 0 : i32
    %2 = arith.cmpi ne, %1, %c0_i32_0 : i32
    scf.if %2 {
      %cst = arith.constant 0.000000e+00 : f32
      %12 = vector.broadcast %cst : f32 to vector<16x128xf32>
      %c0 = arith.constant 0 : index
      %c0_5 = arith.constant 0 : index
      %13 = vector.load %arg7[%c0, %c0_5] : memref<16x128xf32, #tpu.memory_space<vmem>>, vector<16x128xf32>
      tpu.vector_store %arg7[%c0, %c0_5], %12 {strides = array<i32>} : memref<16x128xf32, #tpu.memory_space<vmem>>, vector<16x128xf32>,
    } else {
    }
    %c4_i32 = arith.constant 4 : i32
    %3 = arith.cmpi slt, %arg1, %c4_i32 : i32
    %4 = arith.extui %3 : i1 to i32
    %c0_i32_1 = arith.constant 0 : i32
    %5 = arith.cmpi ne, %4, %c0_i32_1 : i32
    scf.if %5 {
      %c0 = arith.constant 0 : index
      %c0_5 = arith.constant 0 : index
      %12 = vector.load %arg7[%c0, %c0_5] : memref<16x128xf32, #tpu.memory_space<vmem>>, vector<16x128xf32>
      %c0_6 = arith.constant 0 : index
      %c0_7 = arith.constant 0 : index
      %13 = vector.load %arg2[%c0_6, %c0_7] : memref<16x256xbf16, #tpu.memory_space<vmem>>, vector<16x256xbf16>
      %c0_8 = arith.constant 0 : index
      %c0_9 = arith.constant 0 : index
      %14 = vector.load %arg3[%c0_8, %c0_9] : memref<256x128xbf16, #tpu.memory_space<vmem>>, vector<256x128xbf16>
      %cst = arith.constant dense<0.000000e+00> : vector<16x128xf32>
      %15 = tpu.matmul %13, %14, %cst {dimension_numbers = #tpu.dot_dimension_numbers<[1], [0], [0], [1], [0, 0, 1, 1], [], []>} : vector<16x256xbf16>, vector<256x128xbf16>, vector<16x128xf32> -> vector<16x128xf32>
      %16 = arith.addf %12, %15 : vector<16x128xf32>
      %c0_10 = arith.constant 0 : index
      %c0_11 = arith.constant 0 : index
      %17 = vector.load %arg7[%c0_10, %c0_11] : memref<16x128xf32, #tpu.memory_space<vmem>>, vector<16x128xf32>
      tpu.vector_store %arg7[%c0_10, %c0_11], %16 {strides = array<i32>} : memref<16x128xf32, #tpu.memory_space<vmem>>, vector<16x128xf32>,
    } else {
    }
    %c3_i32 = arith.constant 3 : i32
    %6 = arith.cmpi eq, %arg1, %c3_i32 : i32
    %7 = arith.extui %6 : i1 to i32
    %c0_i32_2 = arith.constant 0 : i32
    %8 = arith.cmpi ne, %7, %c0_i32_2 : i32
    scf.if %8 {
      %c0 = arith.constant 0 : index
      %c0_5 = arith.constant 0 : index
      %12 = vector.load %arg7[%c0, %c0_5] : memref<16x128xf32, #tpu.memory_space<vmem>>, vector<16x128xf32>
      %c0_6 = arith.constant 0 : index
      %c0_7 = arith.constant 0 : index
      %13 = vector.load %arg4[%c0_6, %c0_7] : memref<1x128xf32, #tpu.memory_space<vmem>>, vector<1x128xf32>
      %14 = vector.broadcast %13 : vector<1x128xf32> to vector<16x128xf32>
      %15 = arith.addf %12, %14 : vector<16x128xf32>
      %c0_8 = arith.constant 0 : index
      %c0_9 = arith.constant 0 : index
      %16 = vector.load %arg7[%c0_8, %c0_9] : memref<16x128xf32, #tpu.memory_space<vmem>>, vector<16x128xf32>
      tpu.vector_store %arg7[%c0_8, %c0_9], %15 {strides = array<i32>} : memref<16x128xf32, #tpu.memory_space<vmem>>, vector<16x128xf32>,
    } else {
    }
    %c3_i32_3 = arith.constant 3 : i32
    %9 = arith.cmpi sge, %arg1, %c3_i32_3 : i32
    %10 = arith.extui %9 : i1 to i32
    %c0_i32_4 = arith.constant 0 : i32
    %11 = arith.cmpi ne, %10, %c0_i32_4 : i32
    scf.if %11 {
      %c0 = arith.constant 0 : index
      %c0_5 = arith.constant 0 : index
      %12 = vector.load %arg7[%c0, %c0_5] : memref<16x128xf32, #tpu.memory_space<vmem>>, vector<16x128xf32>
      %13 = arith.truncf %12 : vector<16x128xf32> to vector<16x128xbf16>
      %c0_6 = arith.constant 0 : index
      %c0_7 = arith.constant 0 : index
      %14 = vector.load %arg5[%c0_6, %c0_7] : memref<128x128xbf16, #tpu.memory_space<vmem>>, vector<128x128xbf16>
      %cst = arith.constant dense<0.000000e+00> : vector<16x128xf32>
      %15 = tpu.matmul %13, %14, %cst {dimension_numbers = #tpu.dot_dimension_numbers<[1], [0], [0], [1], [0, 0, 1, 1], [], []>} : vector<16x128xbf16>, vector<128x128xbf16>, vector<16x128xf32> -> vector<16x128xf32>
      %c0_8 = arith.constant 0 : index
      %c0_9 = arith.constant 0 : index
      %16 = vector.load %arg6[%c0_8, %c0_9] : memref<1x128xf32, #tpu.memory_space<vmem>>, vector<1x128xf32>
      %17 = vector.broadcast %16 : vector<1x128xf32> to vector<16x128xf32>
      %18 = arith.addf %15, %17 : vector<16x128xf32>
      %c0_10 = arith.constant 0 : index
      %c0_11 = arith.constant 0 : index
      %19 = vector.load %arg8[%c0_10, %c0_11] : memref<16x128xf32, #tpu.memory_space<vmem>>, vector<16x128xf32>
      tpu.vector_store %arg8[%c0_10, %c0_11], %18 {strides = array<i32>} : memref<16x128xf32, #tpu.memory_space<vmem>>, vector<16x128xf32>,
    } else {
    }
    return
  }
  func.func @transform_0(%arg0: i32, %arg1: i32) -> (i32, i32) {
    %c3_i32 = arith.constant 3 : i32
    %0 = arith.minsi %arg1, %c3_i32 : i32
    %c0_i32 = arith.constant 0 : i32
    return %arg0, %0 : i32, i32
  }
  func.func @transform_1(%arg0: i32, %arg1: i32) -> (i32, i32) {
    %c3_i32 = arith.constant 3 : i32
    %0 = arith.minsi %arg1, %c3_i32 : i32
    %c0_i32 = arith.constant 0 : i32
    %c0_i32_0 = arith.constant 0 : i32
    return %0, %c0_i32 : i32, i32
  }
  func.func @transform_2(%arg0: i32, %arg1: i32) -> (i32, i32) {
    %c0_i32 = arith.constant 0 : i32
    %c0_i32_0 = arith.constant 0 : i32
    %c0_i32_1 = arith.constant 0 : i32
    return %c0_i32, %c0_i32_0 : i32, i32
  }
  func.func @transform_3(%arg0: i32, %arg1: i32) -> (i32, i32) {
    %c3_i32 = arith.constant 3 : i32
    %0 = arith.subi %arg1, %c3_i32 : i32
    %c0_i32 = arith.constant 0 : i32
    %1 = arith.maxsi %0, %c0_i32 : i32
    %c0_i32_0 = arith.constant 0 : i32
    %c0_i32_1 = arith.constant 0 : i32
    return %c0_i32_0, %1 : i32, i32
  }
  func.func @transform_4(%arg0: i32, %arg1: i32) -> (i32, i32) {
    %c3_i32 = arith.constant 3 : i32
    %0 = arith.subi %arg1, %c3_i32 : i32
    %c0_i32 = arith.constant 0 : i32
    %1 = arith.maxsi %0, %c0_i32 : i32
    %c0_i32_0 = arith.constant 0 : i32
    %c0_i32_1 = arith.constant 0 : i32
    return %c0_i32_0, %1 : i32, i32
  }
  func.func @transform_5(%arg0: i32, %arg1: i32) -> (i32, i32) {
    %c0_i32 = arith.constant 0 : i32
    %c0_i32_0 = arith.constant 0 : i32
    return %arg0, %c0_i32 : i32, i32
  }
  func.func @transform_6(%arg0: i32, %arg1: i32) -> (i32, i32) {
    %c3_i32 = arith.constant 3 : i32
    %0 = arith.subi %arg1, %c3_i32 : i32
    %c0_i32 = arith.constant 0 : i32
    %1 = arith.maxsi %0, %c0_i32 : i32
    %c0_i32_0 = arith.constant 0 : i32
    return %arg0, %1 : i32, i32
  }
}

</mosaic_0001>

<bundles_post_ra>
// kernel: _fused_forward.1
= control target key start
LH: loop header
LB: loop body
LE: loop exit
PB: predicated region body
PF: predicated region fallthrough
CT: control target
= control target key end

     0   :  { %s1855_s0 = inlined_call_operand.vmem [shape: bf16[16,1024], index: 0, kind: input, shape index: {}]   ;;  %s1856_s1 = inlined_call_operand.hbm [shape: bf16[1024,128], index: 1, kind: input, shape index: {}]   ;;  %s1857_s2 = inlined_call_operand.vmem [shape: f32[1,128], index: 2, kind: input, shape index: {}]   ;;  %s1858_s3 = inlined_call_operand.hbm [shape: bf16[128,256], index: 3, kind: input, shape index: {}]   ;;  %s1859_s4 = inlined_call_operand.vmem [shape: f32[1,256], index: 4, kind: input, shape index: {}]   ;;  %s1860_s5 = inlined_call_operand.hbm [shape: f32[16,128], index: 5, kind: output, shape index: {0}]   ;;  %s1861_s6 = inlined_call_operand.hbm [shape: f32[16,256], index: 6, kind: output, shape index: {1}]  }
   0x1   :  { %1874 = sst [smem:[#allocation22_spill]] %s1855_s0 }
   0x2   :  { %1875 = sst [smem:[#allocation23_spill]] %s1861_s6 }
   0x3   :  { %12 = vsyncpa [#allocation4], 0 }
   0x4   :  { %14 = vsyncpa [#allocation4 + $0x1], 0 }
   0x5   :  { %15 = vsyncpa [#allocation7], 0 }
   0x6   :  { %17 = vsyncpa [#allocation7 + $0x1], 0 }
   0x7   :  { %18 = vsyncpa [#allocation5], 0 }
   0x8   :  { %19 = vsyncpa [#allocation10], 0 }
   0x9   :  { %21 = vsyncpa [#allocation10 + $0x1], 0  ;;  %s1486_s21 = smov 0   ;;  %s1488_s22 = smov 0  }
   0xa   :  { %s1490_s23 = smov 0   ;;  %s1492_s24 = smov 0  }
   0xb   :  { %s1494_s25 = smov 0   ;;  %s1496_s26 = smov 0  }
   0xc   :  { %s1498_s27 = smov 0   ;;  %s1500_s28 = smov 0  }
   0xd   :  { %s1502_s29 = smov 0  }
   0xe LB: > { %1876 = sst [smem:[#allocation15_spill]] %s1404_s21  ;;  %s990_s30 = sadd.s32 4294967295, %s1436_s29   ;;  %s1436_s29 = sphi %s1502_s29, %s27_s29   ;;  %s1432_s28 = sphi %s1500_s28, %s1904_s28   ;;  %s1428_s27 = sphi %s1498_s27, %s1903_s27   ;;  %s1424_s26 = sphi %s1496_s26, %s1910_s26   ;;  %s1420_s25 = sphi %s1494_s25, %s1909_s25   ;;  %s1416_s24 = sphi %s1492_s24, %s1908_s24   ;;  %s1412_s23 = sphi %s1490_s23, %s1907_s23   ;;  %s1408_s22 = sphi %s1488_s22, %s1906_s22   ;;  %s1404_s21 = sphi %s1486_s21, %s1905_s21  }
   0xf   : > { %1877 = sst [smem:[#allocation16_spill]] %s1432_s28  ;;  %s991_s7 = sadd.s32 4294967294, %s1436_s29  }
  0x10   : > { %s36_s8 = sadd.s32 1, %s1432_s28  ;;  %p43_p0 = scmp.lt.s32.totalorder %s1432_s28, 3 }
  0x11   : > { %p37_p1 = scmp.ge.s32.totalorder %s36_s8, 5  ;;  %s52_s9 = sadd.s32 1, %s1424_s26 }
  0x12   : > { %s1535_s10 = scalar_select %p43_p0, %s1432_s28, 3 }
  0x13   : > { %s1912_s8 = smov (%p37_p1, %s36_s8), 0  ;;  %p59_p2 = scmp.ne.s32.totalorder %s1424_s26, %s1420_s25 }
  0x14   : > { %1878 = sst [smem:[#allocation17_spill]] %s1912_s8  ;;  %p60_p3 = scmp.eq.s32.totalorder %s1436_s29, 0 }
  0x15   : > { %p45_p4 = scmp.lt.s32.totalorder %s1912_s8, 3  ;;  %p95_p5 = scmp.ne.s32.totalorder %s1420_s25, %s1416_s24 }
  0x16   : > { %p1546_p6 = por %p60_p3, %p59_p2  ;;  %p1552_p7 = scmp.eq.s32.totalorder %s990_s30, 0 }
  0x17   : > { %s46_s13 = scalar_select %p45_p4, %s1912_s8, 3 }
  0x18   : > { %p1559_p8 = por %p1552_p7, %p95_p5  ;;  %s992_s15 = sadd.s32 4294967293, %s1432_s28 }
  0x19   : > { %s48_s16 = ssub.s32 %s1535_s10, %s46_s13  ;;  %p127_p9 = scmp.gt.s32.totalorder %s992_s15, 0 }
  0x1a   : > { %s1881_s14 = scalar_select %p1559_p8, 1, 0 }
  0x1b   : > { %p50_p10 = scmp.eq.s32.totalorder %s48_s16, 0  ;;  %s993_s17 = sadd.s32 4294967293, %s1912_s8 }
  0x1c   : > { %s1914_s15 = smov (!%p127_p9, %s992_s15), 0  ;;  %p130_p11 = scmp.gt.s32.totalorder %s993_s17, 0 }
  0x1d   : > { %s1569_s18 = scalar_select %p50_p10, %s1424_s26, %s52_s9  }
  0x1e   : > { %s135_s19 = sadd.s32 1, %s1412_s23  ;;  %p142_p12 = scmp.ne.s32.totalorder %s1412_s23, %s1408_s22 }
  0x1f   : > { %1882 = sst [smem:[#allocation18_spill]] %s1569_s18  ;;  %p148_p13 = scmp.ne.s32.totalorder %s1408_s22, %s1404_s21 }
  0x20   : > { %s1916_s17 = smov (!%p130_p11, %s993_s17), 0  ;;  %p1578_p0 = por %p142_p12, %p60_p3 }
  0x21   : > { %p1584_p1 = por %p148_p13, %p1552_p7  ;;  %s132_s13 = ssub.s32 %s1914_s15, %s1916_s17 }
  0x22   : > { %p1591_p2 = scmp.eq.s32.totalorder %s990_s30, 4  ;;  %p133_p4 = scmp.eq.s32.totalorder %s132_s13, 0 }
  0x23   : > { %s1884_s24 = scalar_select %p1584_p1, 1, 0 }
  0x24   : > { %s1885_s9 = scalar_select %p1591_p2, 1, 0 }
  0x25   : > { %p244_p5 = scmp.eq.s32.totalorder %s991_s7, 4  ;;  %p1599_p3 = por %p1591_p2, %p142_p12 }
  0x26   : > { %s1604_s12 = scalar_select %p133_p4, %s1412_s23, %s135_s19  }
  0x27   : > { %s1886_s16 = scalar_select %p1599_p3, 1, 0 }
  0x28   : > { %1888 = sst [smem:[#allocation20_spill]] %s1604_s12  ;;  %p1606_p7 = por %p244_p5, %p148_p13 }
  0x29   : > { %1887 = sst [smem:[#allocation19_spill]] %s1886_s16  ;;  %p999_p9 = scmp.ge.s32.totalorder %s1436_s29, 5 }
  0x2a   : > { %s1889_s8 = scalar_select %p1606_p7, 1, 0 }
  0x2b   : > { %263 = sbr.rel (%p999_p9) target bundleno = 114 (0x72), region = 20 }
  0x2c   : > { %1890 = sst [smem:[#allocation21_spill]] %s1889_s8 }
  0x32   : > { %266 = sbr.rel (!%p1546_p6) target bundleno = 62 (0x3e), region = 24  ;;  %s268_s30 = sand.u32 (%p1546_p6), 1, %s1424_s26  }
  0x33   : > { %s1059_s7 = sshll.u32 (%p1546_p6), %s1535_s10, 3  ;;  %s1000_s17 = sshll.u32 (%p1546_p6), %s268_s30, 4 }
  0x34   : > { %s1891_s0 = sld [smem:[#allocation22_spill]] (%p1546_p6)  ;;  %s270_s18 = scalar_lea.vmem (%p1546_p6), [#allocation2], %s1000_s17 }
  0x3a   : > { %s278_s19 = scalar_lea.vmem %s1891_s0, %s1059_s7 }
  0x3b   : > { %v308_v0 = vld [vmem:[%s278_s19] sm:$0xff] }
  0x3c   : > { %v310_v1 = vld [vmem:[%s278_s19 + $0x20] sm:$0xff]  ;;  %309 = vst [vmem:[%s270_s18] sm:$0xff] %v308_v0 }
  0x3d   : > { %311 = vst [vmem:[%s270_s18 + $0x8] sm:$0xff] %v310_v1 }
  0x3e PF: > { %s318_s12 = sand.u32 1, %s1424_s26   ;;  %s1060_s8 = sshll.u32 %s1535_s10, 11 }
  0x3f   : > { %s1003_s21 = sshll.u32 %s318_s12, 7  ;;  %s1623_s30 = scalar_lea.hbm %s1856_s1, %s1060_s8 }
  0x40   : > { %s322_s28 = scalar_lea.vmem [#allocation3], %s1003_s21  ;;  %s1627_s18 = scalar_lea.sflag [#allocation4], %s318_s12 }
  0x41   : > { %s331_s7 = sshll.u32 %s322_s28, 4  ;;  %s1240_s17 = scalar_lea.hbm %s1623_s30, 2048  ;;  %s1625_s7 = int_to_ptr.vmem [resolvable:$true] %s331_s7 }
  0x42   : > { %p1241_p10 = scmp.ne.s32.totalorder %s1623_s30, %s1240_s17  ;;  %s1244_s6 = scalar_lea.hbm %s1856_s1, 8192 }
  0x43   : > { %p1245_p13 = scmp.lt.u32.totalorder %s1623_s30, %s1856_s1  ;;  %p1246_p4 = scmp.lt.u32.totalorder %s1244_s6, %s1240_s17 }
  0x44   : > { %p1242_p11 = pnand %p1241_p10, %p1546_p6  ;;  %p1248_p9 = scmp.lt.u32.totalorder %s1240_s17, %s1623_s30 }
  0x45   : > { %p1247_p5 = por %p1246_p4, %p1245_p13 }
  0x46   : > { %p1243_p12 = pneg %p1242_p11 }
  0x47   : > { %p1249_p7 = por %p1248_p9, %p1247_p5 }
  0x49   : > { %p1250_p3 = pnand %p1249_p7, %p1243_p12 }
  0x4b   : > { %1253 = shalt.err (!%p1250_p3)
}
  0x4c   : > { %s1254_s21 = scalar_lea.vmem %s1625_s7, 2048  ;;  %s1438_s12 = smov [#allocation3]  }
  0x4d   : > { %p1255_p10 = scmp.ne.s32.totalorder %s1625_s7, %s1254_s21  ;;  %s1258_s19 = sshll.u32 %s1438_s12, 4  ;;  %s1259_s19 = int_to_ptr.vmem [resolvable:$false] %s1258_s19 }
  0x4e   : > { %s1260_s28 = scalar_lea.vmem %s1259_s19, 4096  ;;  %p1261_p1 = scmp.lt.s32.totalorder %s1625_s7, %s1259_s19 }
  0x4f   : > { %p1256_p11 = pnand %p1255_p10, %p1546_p6  ;;  %p1262_p8 = scmp.lt.s32.totalorder %s1260_s28, %s1254_s21 }
  0x51   : > { %p1257_p2 = pneg %p1256_p11  ;;  %p1263_p13 = por %p1262_p8, %p1261_p1 }
  0x53   : > { %p1264_p4 = pnand %p1263_p13, %p1257_p2 }
  0x55   : > { %1267 = shalt.err (!%p1264_p4)
}
  0x56   : > { %s1439_s17 = smov 64   ;;  %s1440_s10 = smov 4  }
  0x57   : > { %1114 = dma.hbm_to_vmem [thread:$0]  (%p1546_p6), %s1623_s30, 2048, %s1625_s7, %s1627_s18, %s1439_s17, %s1439_s17, %s1440_s10  }
  0x58   : > { %s341_s13 = sand.u32 1, %s1412_s23   ;;  %s1008_s6 = sshll.u32 %s1914_s15, 6 }
  0x59   : > { %s1006_s8 = sshll.u32 %s341_s13, 6  ;;  %s1659_s12 = scalar_lea.hbm %s1858_s3, %s1008_s6 }
  0x5a   : > { %s345_s19 = scalar_lea.vmem [#allocation6], %s1006_s8  ;;  %s1663_s11 = scalar_lea.sflag [#allocation7], %s341_s13 }
  0x5b   : > { %s354_s28 = sshll.u32 %s345_s19, 4  ;;  %s1268_s0 = scalar_lea.hbm %s1659_s12, 1024  ;;  %s1661_s28 = int_to_ptr.vmem [resolvable:$true] %s354_s28 }
  0x5c   : > { %p1269_p6 = scmp.ne.s32.totalorder %s1659_s12, %s1268_s0  ;;  %s1272_s7 = scalar_lea.hbm %s1858_s3, 2048 }
  0x5d   : > { %p1273_p2 = scmp.lt.u32.totalorder %s1659_s12, %s1858_s3  ;;  %p1274_p3 = scmp.lt.u32.totalorder %s1272_s7, %s1268_s0 }
  0x5e   : > { %p1270_p8 = pnand %p1269_p6, %p1578_p0  ;;  %p1276_p12 = scmp.lt.u32.totalorder %s1268_s0, %s1659_s12 }
  0x5f   : > { %p1275_p7 = por %p1274_p3, %p1273_p2 }
  0x60   : > { %p1271_p1 = pneg %p1270_p8 }
  0x61   : > { %p1277_p5 = por %p1276_p12, %p1275_p7 }
  0x63   : > { %p1278_p9 = pnand %p1277_p5, %p1271_p1 }
  0x65   : > { %1281 = shalt.err (!%p1278_p9)
}
  0x66   : > { %s1282_s13 = scalar_lea.vmem %s1661_s28, 1024  ;;  %s1441_s8 = smov [#allocation6]  }
  0x67   : > { %p1283_p10 = scmp.ne.s32.totalorder %s1661_s28, %s1282_s13  ;;  %s1286_s16 = sshll.u32 %s1441_s8, 4  ;;  %s1287_s16 = int_to_ptr.vmem [resolvable:$false] %s1286_s16 }
  0x68   : > { %s1288_s21 = scalar_lea.vmem %s1287_s16, 2048  ;;  %p1289_p4 = scmp.lt.s32.totalorder %s1661_s28, %s1287_s16 }
  0x69   : > { %p1284_p11 = pnand %p1283_p10, %p1578_p0  ;;  %p1290_p6 = scmp.lt.s32.totalorder %s1288_s21, %s1282_s13 }
  0x6b   : > { %p1285_p13 = pneg %p1284_p11  ;;  %p1291_p8 = por %p1290_p6, %p1289_p4 }
  0x6d   : > { %p1292_p2 = pnand %p1291_p8, %p1285_p13 }
  0x6f   : > { %1295 = shalt.err (!%p1292_p2)
}
  0x70   : > { %s1442_s0 = smov 128  }
  0x71   : > { %1115 = dma.hbm_to_vmem [thread:$0]  (%p1578_p0), %s1659_s12, 1024, %s1661_s28, %s1663_s11, %s1442_s0, %s1439_s17, %s1440_s10  }
  0x72 PF: > { %p1009_p1 = scmp.ge.s32.totalorder %s1436_s29, 1  ;;  %p374_p3 = scmp.lt.s32.totalorder %s1436_s29, 6 }
  0x74   : > { %p375_p7 = pnand %p1009_p1, %p374_p3 }
  0x75   : > { %s381_s19 = sand.u32 (!%p375_p7), 1, %s1420_s25   ;;  %p1892_p12 = scmp.ne.s32.totalorder (!%p375_p7), %s1881_s14, 0 }
  0x76   : > { %378 = sbr.rel (%p375_p7) target bundleno = 709 (0x2c5), region = 74  ;;  %s1010_s15 = sshll.u32 (!%p375_p7), %s381_s19, 4 }
  0x77   : > { %s1011_s30 = sshll.u32 (!%p375_p7), %s381_s19, 7  ;;  %s1692_s7 = scalar_lea.vmem (!%p375_p7), [#allocation2], %s1010_s15 }
  0x78   : > { %s388_s20 = scalar_lea.sflag (!%p375_p7), [#allocation4], %s381_s19  ;;  %s1694_s18 = scalar_lea.vmem (!%p375_p7), [#allocation3], %s1011_s30 }
  0x7d   : > { %1387 = dma.done.wait (%p1892_p12), %s388_s20, 2048  }
  0x7e   : > { %1389 = vsyncadd (%p1892_p12), %s388_s20, 4294965248  ;;  %s1701_s17 = sand.u32 1, %s1408_s22   ;;  %p1893_p0 = scmp.ne.s32.totalorder %s1884_s24, 0 }
  0x7f   : > { %s1012_s10 = sshll.u32 %s1701_s17, 6  ;;  %s397_s12 = scalar_lea.sflag [#allocation7], %s1701_s17 }
  0x80   : > { %s1705_s28 = scalar_lea.vmem [#allocation6], %s1012_s10 }
  0x81   : > { %1391 = dma.done.wait (%p1893_p0), %s397_s12, 1024  }
  0x82   : > { %1393 = vsyncadd (%p1893_p0), %s397_s12, 4294966272  ;;  %s1013_s11 = sshll.u32 %s1701_s17, 4  ;;  %s1014_s14 = sadd.s32 4294967293, %s1428_s27 }
  0x83   : > { %p455_p5 = scmp.gt.s32.totalorder %s1014_s14, 0  ;;  %p1015_p9 = scmp.lt.s32.totalorder %s1014_s14, 1 }
  0x84   : > { %s1722_s21 = scalar_lea.vmem [#allocation9], %s1013_s11  ;;  %p1020_p10 = scmp.ne.s32.totalorder %s1428_s27, 0 }
  0x85   : > { %s1918_s14 = smov (!%p455_p5, %s1014_s14), 0  ;;  %v1443_v2 = vmov (!%p1020_p10), 0.0  }
  0x86   : > { %s1716_s6 = scalar_select %p1015_p9, %s1918_s14, 1 }
  0x87   : > { %472 = sbr.rel (%p1020_p10) target bundleno = 142 (0x8e), region = 90  ;;  %473 = vst [vmem:[#allocation8] sm:$0xff] (!%p1020_p10), %v1443_v2  ;;  %474 = vst [vmem:[#allocation8 + $0x8] sm:$0xff] (!%p1020_p10), %v1443_v2 }
  0x88   : > { %s459_s16 = scalar_lea.vmem %s1859_s4, %s1716_s6 }
  0x8e PF: > { %p1021_p11 = scmp.ge.s32.totalorder %s1428_s27, 4 }
  0x8f   : > { %v1213_v3 = vld [vmem:[%s1694_s18 + $0x40] sm:$0xff] (!%p1021_p11)   ;;  %v1215_v5 = vld [vmem:[%s1694_s18 + $0x48] sm:$0xff] (!%p1021_p11)   ;;  %v1217_v7 = vld [vmem:[%s1694_s18 + $0x50] sm:$0xff] (!%p1021_p11)  }
  0x90   : > { %478 = sbr.rel (%p1021_p11) target bundleno = 396 (0x18c), region = 94  ;;  %v1214_v4 = vld [vmem:[%s1694_s18] sm:$0xff] (!%p1021_p11)   ;;  %1063 = vmatprep.subr.bf16.mxu0 (!%p1021_p11), %v1213_v3  ;;  %v1216_v6 = vld [vmem:[%s1694_s18 + $0x8] sm:$0xff] (!%p1021_p11)   ;;  %v1218_v8 = vld [vmem:[%s1694_s18 + $0x10] sm:$0xff] (!%p1021_p11)  }
  0x91   : > { %1064 = vmatpush3.bf16.msra.mxu0 (!%p1021_p11), %v1214_v4  ;;  %v1219_v9 = vld [vmem:[%s1694_s18 + $0x58] sm:$0xff] (!%p1021_p11)   ;;  %v1221_v11 = vld [vmem:[%s1694_s18 + $0x60] sm:$0xff] (!%p1021_p11)   ;;  %v1223_v13 = vld [vmem:[%s1694_s18 + $0x68] sm:$0xff] (!%p1021_p11)  }
  0x92   : > { %1065 = vmatprep.subr.bf16.mxu0 (!%p1021_p11), %v1215_v5  ;;  %v1220_v10 = vld [vmem:[%s1694_s18 + $0x18] sm:$0xff] (!%p1021_p11)   ;;  %v1222_v12 = vld [vmem:[%s1694_s18 + $0x20] sm:$0xff] (!%p1021_p11)   ;;  %v1224_v15 = vld [vmem:[%s1694_s18 + $0x28] sm:$0xff] (!%p1021_p11)  }
  0x93   : > { %v1231_v14 = vld [vmem:[%s1692_s7 + $0x4] ss:$8 sps:$4 sm:$0xff] (!%p1021_p11)   ;;  %v1229_v20 = vld [vmem:[%s1692_s7] ss:$8 sps:$4 sm:$0xff] (!%p1021_p11)  }
  0x94   : > { %653 = vmatprep.mubr.bf16.mxu0 (!%p1021_p11), %v1231_v14  ;;  %v1225_v16 = vld [vmem:[%s1694_s18 + $0x70] sm:$0xff] (!%p1021_p11)   ;;  %v1227_v18 = vld [vmem:[%s1694_s18 + $0x78] sm:$0xff] (!%p1021_p11)   ;;  %v479_v22 = vld [vmem:[#allocation8] sm:$0xff] (!%p1021_p11) }
  0x95   : > { %1066 = vmatpush3.bf16.msra.mxu0 (!%p1021_p11), %v1216_v6  ;;  %v1226_v17 = vld [vmem:[%s1694_s18 + $0x30] sm:$0xff] (!%p1021_p11)   ;;  %v1228_v19 = vld [vmem:[%s1694_s18 + $0x38] sm:$0xff] (!%p1021_p11)   ;;  %v480_v26 = vld [vmem:[#allocation8 + $0x8] sm:$0xff] (!%p1021_p11) }
  0x96   : > { %1067 = vmatprep.subr.bf16.mxu0 (!%p1021_p11), %v1217_v7 }
  0x99   : > { %1068 = vmatpush3.bf16.msra.mxu0 %v1218_v8 }
  0x9a   : > { %1069 = vmatprep.subr.bf16.mxu0 %v1219_v9 }
  0x9d   : > { %1070 = vmatpush3.bf16.msra.mxu0 %v1220_v10 }
  0x9e   : > { %1071 = vmatprep.subr.bf16.mxu0 %v1221_v11 }
  0xa1   : > { %1072 = vmatpush3.bf16.msra.mxu0 %v1222_v12 }
  0xa2   : > { %1073 = vmatprep.subr.bf16.mxu0 %v1223_v13 }
  0xa5   : > { %1074 = vmatpush3.bf16.msra.mxu0 %v1224_v15 }
  0xa6   : > { %1075 = vmatprep.subr.bf16.mxu0 %v1225_v16 }
  0xa9   : > { %1076 = vmatpush3.bf16.msra.mxu0 %v1226_v17 }
  0xaa   : > { %1077 = vmatprep.subr.bf16.mxu0 %v1227_v18 }
  0xad   : > { %1078 = vmatpush3.bf16.msra.mxu0 %v1228_v19 }
  0xb0   : > { %654 = vmatmul.mubr.bf16.vlgmr.msra.gmra.mrb[0].mxu0 %v1229_v20 }
 0x183   : > { %v1079_v21 = vpop.f32.mrb[0].mxu0 }
 0x184   : > { %v1080_v23 = vpop.f32.mrb[1].mxu0 }
 0x185   : > { %v1081_v24 = vadd.f32 %v1080_v23, %v1079_v21  ;;  %v1082_v25 = vpop.f32.mrb[2].mxu0 }
 0x186   : > { %v1083_v27 = vpop.f32.mrb[3].mxu0 }
 0x187   : > { %v662_v28 = vadd.f32 %v1081_v24, %v479_v22  ;;  %v1084_v29 = vadd.f32 %v1083_v27, %v1082_v25 }
 0x189   : > { %664 = vst [vmem:[#allocation8] sm:$0xff] %v662_v28  ;;  %v663_v30 = vadd.f32 %v1084_v29, %v480_v26 }
 0x18b   : > { %665 = vst [vmem:[#allocation8 + $0x8] sm:$0xff] %v663_v30 }
 0x18c PF: > { %p1040_p13 = scmp.ne.s32.totalorder %s1428_s27, 3 }
 0x18d   : > { %v1041_v32 = vld [vmem:[%s1857_s2] ss:$0 sm:$0xff] (!%p1040_p13) }
 0x18e   : > { %669 = sbr.rel (%p1040_p13) target bundleno = 406 (0x196), region = 98 }
 0x190   : > { %v670_v31 = vld [vmem:[#allocation8] sm:$0xff] (!%p1040_p13) }
 0x191   : > { %v679_v34 = vadd.f32 (!%p1040_p13), %v1041_v32, %v670_v31 }
 0x192   : > { %v671_v33 = vld [vmem:[#allocation8 + $0x8] sm:$0xff] (!%p1040_p13) }
 0x193   : > { %v680_v35 = vadd.f32 (!%p1040_p13), %v1041_v32, %v671_v33  ;;  %681 = vst [vmem:[#allocation8] sm:$0xff] (!%p1040_p13), %v679_v34 }
 0x195   : > { %682 = vst [vmem:[#allocation8 + $0x8] sm:$0xff] %v680_v35 }
 0x196 PF: > { %p1042_p4 = scmp.lt.s32.totalorder %s1428_s27, 3 }
 0x197   : > { %v1232_v36 = vld [vmem:[%s1705_s28] sm:$0xff] (!%p1042_p4)   ;;  %v1444_v37 = vmov (!%p1042_p4), 0.0   ;;  %v1233_v38 = vld [vmem:[%s1705_s28 + $0x8] sm:$0xff] (!%p1042_p4)   ;;  %vm1445_vm0 = vmmov (!%p1042_p4), 0   ;;  %v1234_v39 = vld [vmem:[%s1705_s28 + $0x10] sm:$0xff] (!%p1042_p4)  }
 0x198   : > { %686 = sbr.rel (%p1042_p4) target bundleno = 657 (0x291), region = 102  ;;  %1094 = vmatprep.subr.bf16.mxu0 (!%p1042_p4), %v1444_v37  ;;  %1110 = vmatprep.mubr.msk.bf16.mxu0 (!%p1042_p4), %vm1445_vm0, %v1444_v37  ;;  %v1235_v40 = vld [vmem:[%s1705_s28 + $0x18] sm:$0xff] (!%p1042_p4)   ;;  %v1236_v41 = vld [vmem:[%s1705_s28 + $0x20] sm:$0xff] (!%p1042_p4)   ;;  %v1237_v42 = vld [vmem:[%s1705_s28 + $0x28] sm:$0xff] (!%p1042_p4)  }
 0x199   : > { %1095 = vmatpush3.bf16.msra.mxu0 (!%p1042_p4), %v1232_v36  ;;  %v1238_v43 = vld [vmem:[%s1705_s28 + $0x30] sm:$0xff] (!%p1042_p4)   ;;  %v1239_v44 = vld [vmem:[%s1705_s28 + $0x38] sm:$0xff] (!%p1042_p4)   ;;  %v1043_v48 = vld [vmem:[%s459_s16] ss:$0 sm:$0xff] (!%p1042_p4) }
 0x19a   : > { %1096 = vmatprep.subr.bf16.mxu0 (!%p1042_p4), %v1444_v37 }
 0x19b   : > { %v687_v45 = vld [vmem:[#allocation8] sm:$0xff] (!%p1042_p4) }
 0x19c   : > { %v688_v46 = vld [vmem:[#allocation8 + $0x8] sm:$0xff] (!%p1042_p4) }
 0x19d   : > { %1097 = vmatpush3.bf16.msra.mxu0 (!%p1042_p4), %v1233_v38  ;;  %v689_v47 = vpack.c.bf16 (!%p1042_p4), %v688_v46, %v687_v45 }
 0x19e   : > { %1098 = vmatprep.subr.bf16.mxu0 (!%p1042_p4), %v1444_v37 }
 0x1a1   : > { %1099 = vmatpush3.bf16.msra.mxu0 %v1234_v39 }
 0x1a2   : > { %1100 = vmatprep.subr.bf16.mxu0 %v1444_v37 }
 0x1a5   : > { %1101 = vmatpush3.bf16.msra.mxu0 %v1235_v40 }
 0x1a6   : > { %1102 = vmatprep.subr.bf16.mxu0 %v1444_v37 }
 0x1a9   : > { %1103 = vmatpush3.bf16.msra.mxu0 %v1236_v41 }
 0x1aa   : > { %1104 = vmatprep.subr.bf16.mxu0 %v1444_v37 }
 0x1ad   : > { %1105 = vmatpush3.bf16.msra.mxu0 %v1237_v42 }
 0x1ae   : > { %1106 = vmatprep.subr.bf16.mxu0 %v1444_v37 }
 0x1b1   : > { %1107 = vmatpush3.bf16.msra.mxu0 %v1238_v43 }
 0x1b2   : > { %1108 = vmatprep.subr.bf16.mxu0 %v1444_v37 }
 0x1b5   : > { %1109 = vmatpush3.bf16.msra.mxu0 %v1239_v44 }
 0x1b8   : > { %1111 = vmatmul.mubr.bf16.vlgmr.msra.gmra.mrb[0].mxu0 %v689_v47 }
 0x28b   : > { %v795_v49 = vpop.f32.mrb[0].mxu0 }
 0x28c   : > { %v796_v50 = vadd.f32 %v1043_v48, %v795_v49  ;;  %v1112_v51 = vpop.f32.mrb[1].mxu0 }
 0x28d   : > { %v798_v52 = vpop.f32.mrb[2].mxu0 }
 0x28e   : > { %802 = vst [vmem:[%s1722_s21] sm:$0xff] %v796_v50  ;;  %v799_v53 = vadd.f32 %v1043_v48, %v798_v52  ;;  %v1113_v54 = vpop.f32.mrb[3].mxu0 }
 0x290   : > { %803 = vst [vmem:[%s1722_s21 + $0x8] sm:$0xff] %v799_v53 }
 0x291 PF: > { %s1446_s15 = smov [#allocation8]   ;;  %p1894_p8 = scmp.ne.s32.totalorder %s1885_s9, 0 }
 0x292   : > { %s818_s30 = sshll.u32 %s1446_s15, 4  ;;  %s819_s30 = int_to_ptr.vmem [resolvable:$true] %s818_s30 }
 0x293   : > { %s1296_s7 = scalar_lea.vmem %s819_s30, 256  ;;  %p1303_p3 = scmp.lt.s32.totalorder %s819_s30, %s819_s30 }
 0x294   : > { %p1297_p6 = scmp.ne.s32.totalorder %s819_s30, %s1296_s7  ;;  %p1304_p7 = scmp.lt.s32.totalorder %s1296_s7, %s1296_s7 }
 0x296   : > { %p1298_p2 = pnand %p1297_p6, %p1894_p8  ;;  %p1305_p12 = por %p1304_p7, %p1303_p3 }
 0x298   : > { %p1299_p1 = pneg %p1298_p2 }
 0x29a   : > { %p1306_p0 = pnand %p1305_p12, %p1299_p1 }
 0x29c   : > { %1309 = shalt.err (!%p1306_p0)
}
 0x29d   : > { %s1310_s10 = scalar_lea.hbm %s1860_s5, 256 }
 0x29e   : > { %p1311_p5 = scmp.ne.s32.totalorder %s1860_s5, %s1310_s10  ;;  %p1316_p11 = scmp.lt.u32.totalorder %s1310_s10, %s1860_s5 }
 0x2a0   : > { %p1312_p9 = pnand %p1311_p5, %p1894_p8 }
 0x2a2   : > { %p1313_p10 = pneg %p1312_p9 }
 0x2a4   : > { %p1318_p13 = pnand %p1316_p11, %p1313_p10 }
 0x2a6   : > { %1321 = shalt.err (!%p1318_p13)
}
 0x2a7   : > { %s1447_s13 = smov 128   ;;  %s1895_s8 = sld [smem:[#allocation19_spill]] }
 0x2a8   : > { %s1448_s16 = smov 8   ;;  %s1055_s27 = sshll.u32 %s1918_s14, 7 }
 0x2a9   : > { %1119 = dma.vmem_to_hbm [thread:$0]  (%p1894_p8), %s819_s30, 256, %s1860_s5, [#allocation5], %s1447_s13, %s1447_s13, %s1448_s16  }
 0x2aa   : > { %s1896_s7 = sld [smem:[#allocation23_spill]]  ;;  %s839_s18 = sshll.u32 %s1722_s21, 4  ;;  %s1792_s18 = int_to_ptr.vmem [resolvable:$true] %s839_s18 }
 0x2ab   : > { %s805_s10 = scalar_lea.sflag [#allocation10], %s1701_s17  ;;  %s1322_s12 = scalar_lea.vmem %s1792_s18, 256 }
 0x2ac   : > { %p1323_p4 = scmp.ne.s32.totalorder %s1792_s18, %s1322_s12  ;;  %s1449_s28 = smov [#allocation9]  }
 0x2ad   : > { %p1897_p6 = scmp.ne.s32.totalorder %s1895_s8, 0  ;;  %s1326_s30 = sshll.u32 %s1449_s28, 4  ;;  %s1327_s30 = int_to_ptr.vmem [resolvable:$false] %s1326_s30 }
 0x2ae   : > { %s1328_s14 = scalar_lea.vmem %s1327_s30, 512  ;;  %p1329_p3 = scmp.lt.s32.totalorder %s1792_s18, %s1327_s30 }
 0x2af   : > { %p1324_p2 = pnand %p1323_p4, %p1897_p6  ;;  %p1330_p7 = scmp.lt.s32.totalorder %s1328_s14, %s1322_s12 }
 0x2b0   : > { %s1789_s20 = scalar_lea.hbm %s1896_s7, %s1055_s27 }
 0x2b1   : > { %p1325_p1 = pneg %p1324_p2  ;;  %p1331_p12 = por %p1330_p7, %p1329_p3 }
 0x2b3   : > { %p1332_p0 = pnand %p1331_p12, %p1325_p1 }
 0x2b5   : > { %1335 = shalt.err (!%p1332_p0)
}
 0x2b6   : > { %s1336_s21 = scalar_lea.hbm %s1789_s20, 256  ;;  %s1340_s24 = scalar_lea.hbm %s1896_s7, 512 }
 0x2b7   : > { %p1337_p5 = scmp.ne.s32.totalorder %s1789_s20, %s1336_s21  ;;  %p1341_p11 = scmp.lt.u32.totalorder %s1789_s20, %s1896_s7 }
 0x2b8   : > { %p1342_p13 = scmp.lt.u32.totalorder %s1340_s24, %s1336_s21  ;;  %p1344_p2 = scmp.lt.u32.totalorder %s1336_s21, %s1789_s20 }
 0x2b9   : > { %p1338_p9 = pnand %p1337_p5, %p1897_p6 }
 0x2ba   : > { %p1343_p4 = por %p1342_p13, %p1341_p11 }
 0x2bb   : > { %p1339_p10 = pneg %p1338_p9 }
 0x2bc   : > { %p1345_p1 = por %p1344_p2, %p1343_p4 }
 0x2be   : > { %p1346_p3 = pnand %p1345_p1, %p1339_p10 }
 0x2c0   : > { %1349 = shalt.err (!%p1346_p3)
}
 0x2c1   : > { %s1450_s19 = smov 256  }
 0x2c2   : > { %1120 = dma.vmem_to_hbm [thread:$0]  (%p1897_p6), %s1792_s18, 256, %s1789_s20, %s805_s10, %s1447_s13, %s1450_s19, %s1448_s16  }
 0x2c3   : > { %1395 = dma.done.wait (%p1894_p8), [#allocation5], 256  }
 0x2c4   : > { %1397 = vsyncadd (%p1894_p8), [#allocation5], 4294967040 }
 0x2c5 PF: > { %s1898_s15 = sld [smem:[#allocation15_spill]]  ;;  %s1899_s12 = sld [smem:[#allocation21_spill]] }
 0x2c6   : > { %p1130_p7 = scmp.ge.s32.totalorder %s1436_s29, 2 }
 0x2cb   : > { %s858_s28 = sand.u32 1, %s1898_s15   ;;  %p1900_p12 = scmp.ne.s32.totalorder %s1899_s12, 0 }
 0x2cc   : > { %s859_s8 = scalar_lea.sflag [#allocation10], %s858_s28 }
 0x2cd   : > { %p1125_p0 = pnand %p1130_p7, %p1900_p12 }
 0x2cf   : > { %1399 = dma.done.wait (!%p1125_p0), %s859_s8, 256  }
 0x2d0   : > { %1401 = vsyncadd (!%p1125_p0), %s859_s8, 4294967040  ;;  %s27_s29 = sadd.s32 1, %s1436_s29   ;;  %s1901_s17 = sld [smem:[#allocation20_spill]] }
 0x2d1   : > { %p24_p5 = scmp.ge.s32.totalorder %s27_s29, 7   ;;  %s1902_s9 = sld [smem:[#allocation18_spill]] }
 0x2d2   : > { %s1903_s27 = sld [smem:[#allocation16_spill]]  ;;  %s1904_s28 = sld [smem:[#allocation17_spill]] }
 0x2d3   : > { %s1905_s21 = smov %s1408_s22  ;;  %s1906_s22 = smov %s1412_s23 }
 0x2d4   : > { %s1908_s24 = smov %s1420_s25  ;;  %s1909_s25 = smov %s1424_s26 }
 0x2d5   :  { %26 = sbr.rel (!%p24_p5) target bundleno = 14 (0xe), region = 173 }
 0x2d6   : > { %s1907_s23 = smov %s1901_s17 }
 0x2d7   : > { %s1910_s26 = smov %s1902_s9 }
 0x2dc   :  { %864 = vsyncpa [#allocation4], 1 }
 0x2dd   :  { %866 = vsyncpa [#allocation4 + $0x1], 1 }
 0x2de   :  { %867 = vsyncpa [#allocation7], 1 }
 0x2df   :  { %869 = vsyncpa [#allocation7 + $0x1], 1 }
 0x2e0   :  { %870 = vsyncpa [#allocation5], 1 }
 0x2e1   :  { %872 = vsyncpa [#allocation5 + $0x1], 1 }
 0x2e2   :  { %873 = vsyncpa [#allocation10], 1 }
 0x2e3   :  { %875 = vsyncpa [#allocation10 + $0x1], 1 }

</bundles_post_ra>
